<compile_context>
chip_gen: v6e
topology: v6e:2x2x1
jax: 0.10.0
libtpu: 0.0.40
codegen_flags: <defaults>
</compile_context>

<pallas_src>
import jax
import jax.numpy as jnp
import numpy as np
from jax import lax
from jax.experimental import pallas as pl
from jax.experimental.pallas import tpu as pltpu


def _pick_hw_tile(hw_total, default):
    # Full extent satisfies the (8,128) BlockSpec rule; otherwise use a multiple of 128.
    if hw_total <= default:
        return hw_total
    return max(128, (default // 128) * 128)


# ----------------------------------------------------------------------------
# Pallas kernel 1: lane-dense per-pixel augmentation
#   out[:, p] = y[:, p] + Tt[:, label[p]]     (Tt is (C, C), Tt[c, k] = T[k, c])
# The ragged final spatial block reads garbage past HW and computes on it; this is correct
# because Pallas clips the partial output block on write (do not convert to manual DMA
# without re-adding an explicit bounds mask).
# ----------------------------------------------------------------------------
def _isda_aug_kernel(lab_ref, y_ref, tt_ref, out_ref):
    C, Kc = tt_ref.shape
    hw = lab_ref.shape[-1]
    labels = lab_ref[0]                                          # (1, hw) int32
    iota = lax.broadcasted_iota(jnp.int32, (Kc, hw), 0)          # class index on sublanes
    onehot = (labels == iota).astype(jnp.float32)                # (Kc, hw); zero col for 255
    add = jnp.dot(tt_ref[...], onehot,
                  preferred_element_type=jnp.float32)            # (C, hw)
    out_ref[0] = (y_ref[0] + add).astype(out_ref.dtype)


def isda_aug_pallas(table_t, y_nchw, labels_nhw, *, hw_tile=16384):
    """table_t: (C, C) f32 with table_t[c, k]; y_nchw: (N, C, H, W); labels_nhw: (N, H, W)."""
    N, C, H, W = y_nchw.shape
    HW = H * W
    Kc = table_t.shape[1]
    y3 = y_nchw.reshape(N, C, HW)                  # pure reshape, no transpose
    lab3 = labels_nhw.reshape(N, 1, HW).astype(jnp.int32)
    hw_tile = _pick_hw_tile(HW, hw_tile)
    grid = (N, pl.cdiv(HW, hw_tile))

    out = pl.pallas_call(
        _isda_aug_kernel,
        out_shape=jax.ShapeDtypeStruct((N, C, HW), y3.dtype),
        grid=grid,
        in_specs=[
            pl.BlockSpec((1, 1, hw_tile), lambda n, j: (n, 0, j)),   # labels
            pl.BlockSpec((1, C, hw_tile), lambda n, j: (n, 0, j)),   # logits y (lane-dense)
            pl.BlockSpec((C, Kc), lambda n, j: (0, 0)),              # resident sigma2 table
        ],
        out_specs=pl.BlockSpec((1, C, hw_tile), lambda n, j: (n, 0, j)),
        # Alias y -> out: in-place update when y is a donatable intermediate (XLA inserts a
        # copy automatically if it is a live parameter, so this is always safe).
        input_output_aliases={1: 0},
        compiler_params=pltpu.CompilerParams(
            dimension_semantics=("parallel", "parallel")),
        cost_estimate=pl.CostEstimate(
            flops=2 * N * HW * Kc * C + N * HW * C,
            transcendentals=0,
            bytes_accessed=2 * N * C * HW * y3.dtype.itemsize + N * HW * 4),
    )(lab3, y3, table_t.astype(jnp.float32))
    return out.reshape(N, C, H, W)


# ----------------------------------------------------------------------------
# Pallas kernel 2: fused EstimatorCV statistics reduction
#   cnt[k]      = #pixels of class k
#   sums[k, a]  = sum_p f[a, p] * onehot[k, p]
#   sqs[k, a]   = sum_p f[a, p]^2 * onehot[k, p]
# Grid reduces over (batch, spatial tiles) with VMEM-resident output accumulators.
# ----------------------------------------------------------------------------
def estimator_stats_pallas(labels3, feats3, class_num_total, *, hw_tile=16384):
    N, A, HW = feats3.shape
    Kc = class_num_total
    hw_tile = _pick_hw_tile(HW, hw_tile)
    grid = (N, pl.cdiv(HW, hw_tile))

    def kernel(lab_ref, f_ref, cnt_ref, sums_ref, sqs_ref):
        @pl.when(jnp.logical_and(pl.program_id(0) == 0, pl.program_id(1) == 0))
        def _init():
            cnt_ref[...] = jnp.zeros_like(cnt_ref)
            sums_ref[...] = jnp.zeros_like(sums_ref)
            sqs_ref[...] = jnp.zeros_like(sqs_ref)

        lab = lab_ref[0]                                             # (1, hw) int32
        lab = jnp.where(lab == 255, Kc - 1, lab)                     # ignore label -> extra class
        # Mask lanes past HW in the ragged final spatial block.
        pos = pl.program_id(1) * hw_tile + lax.broadcasted_iota(jnp.int32, (1, hw_tile), 1)
        valid = pos < HW
        iota = lax.broadcasted_iota(jnp.int32, (Kc, hw_tile), 0)
        onehot = jnp.logical_and(lab == iota, valid).astype(jnp.float32)   # (Kc, hw)

        f = f_ref[0].astype(jnp.float32)                             # (A, hw)
        dn = (((1,), (1,)), ((), ()))                                # contract over hw (lanes)
        sums_ref[...] += lax.dot_general(onehot, f, dn,
                                         preferred_element_type=jnp.float32)
        sqs_ref[...] += lax.dot_general(onehot, f * f, dn,
                                        preferred_element_type=jnp.float32)
        cnt_ref[...] += jnp.sum(onehot, axis=1, keepdims=True)

    cnt, sums, sqs = pl.pallas_call(
        kernel,
        out_shape=(jax.ShapeDtypeStruct((Kc, 1), jnp.float32),
                   jax.ShapeDtypeStruct((Kc, A), jnp.float32),
                   jax.ShapeDtypeStruct((Kc, A), jnp.float32)),
        grid=grid,
        in_specs=[
            pl.BlockSpec((1, 1, hw_tile), lambda n, j: (n, 0, j)),   # labels
            pl.BlockSpec((1, A, hw_tile), lambda n, j: (n, 0, j)),   # features (lane-dense)
        ],
        out_specs=(
            pl.BlockSpec((Kc, 1), lambda n, j: (0, 0)),              # resident accumulators
            pl.BlockSpec((Kc, A), lambda n, j: (0, 0)),
            pl.BlockSpec((Kc, A), lambda n, j: (0, 0)),
        ),
        compiler_params=pltpu.CompilerParams(
            dimension_semantics=("arbitrary", "arbitrary")),
    )(labels3, feats3.astype(feats3.dtype))
    return cnt[:, 0], sums, sqs


def _finish_estimator_update(cov, ave, amount, cnt, sums, sqs):
    """Tiny (Kc, A) finalize of the running statistics (plain JAX; matches EstimatorCV)."""
    denom = jnp.where(cnt == 0, 1.0, cnt)[:, None]
    ave_CxA = sums / denom
    var_temp = jnp.maximum(sqs / denom - ave_CxA ** 2, 0.0)
    weight_CV = cnt[:, None] / (cnt[:, None] + amount[:, None])      # NaN on 0/0
    weight_CV = jnp.where(jnp.isnan(weight_CV), 0.0, weight_CV)
    additional_CV = weight_CV * (1.0 - weight_CV) * (ave - ave_CxA) ** 2
    new_cov = cov * (1.0 - weight_CV) + var_temp * weight_CV + additional_CV
    new_ave = ave * (1.0 - weight_CV) + ave_CxA * weight_CV
    new_amount = amount + cnt
    return new_cov, new_ave, new_amount


# ----------------------------------------------------------------------------
# ISDALoss.forward (functional: estimator state is passed in / returned)
# ----------------------------------------------------------------------------
def isda_loss_forward(features, conv_weight, y, target_x, ratio, cov, ave, amount):
    # features: (N, A, H, W), y: (N, C, H, W), target_x: (N, h, w) int labels
    N, A, H, W = features.shape
    C = y.shape[1]
    Kc = cov.shape[0]                                                # class_num + 1
    h, w = target_x.shape[1], target_x.shape[2]

    # F.interpolate(..., size=(H, W), mode='nearest') on the label map
    row_idx = (jnp.arange(H) * h) // H
    col_idx = (jnp.arange(W) * w) // W
    tgt = target_x[:, row_idx][:, :, col_idx]                        # (N, H, W)

    labels3 = tgt.reshape(N, 1, H * W).astype(jnp.int32)
    feats3 = features.reshape(N, A, H * W)                           # no transpose

    # EstimatorCV.update_CV: fused Pallas reduction + tiny finalize
    cnt, sums, sqs = estimator_stats_pallas(labels3, feats3, Kc)
    new_cov, new_ave, new_amount = _finish_estimator_update(
        cov.astype(jnp.float32), ave.astype(jnp.float32), amount.astype(jnp.float32),
        cnt, sums, sqs)

    # sigma2 lookup table: T[k, c] = 0.5 * ratio * sum_a (W[c,a] - W[k,a])^2 * CV[k,a]
    # Only class_num distinct rows exist, so it is tiny (C x C) and computed once in JAX.
    weight_m = conv_weight.reshape(C, A).astype(jnp.float32)
    diff = weight_m[None, :, :] - weight_m[:, None, :]               # diff[k,c,a] = W[c,a]-W[k,a]
    table = 0.5 * ratio * jnp.einsum('kca,ka->kc', diff * diff,
                                     new_cov[:C].astype(jnp.float32))
    table_t = table.T                                                # (c, k)

    # Pallas hot path: out = y + Tt[:, label] (ignore 255 via zero one-hot column)
    aug = isda_aug_pallas(table_t, y, tgt)
    return aug, (new_cov, new_ave, new_amount)


# ----------------------------------------------------------------------------
# Pure-numpy references (direct, un-factored PyTorch formulas)
# ----------------------------------------------------------------------------
def _ref_update_cv(cov, ave, amount, features, labels, Kc):
    N, A = features.shape
    mask = (labels == 255).astype(np.int64)
    lab = (1 - mask) * labels + mask * (Kc - 1)
    onehot = np.zeros((N, Kc), np.float32)
    onehot[np.arange(N), lab] = 1.0
    oh3 = onehot[:, :, None]
    fbs = features[:, None, :] * oh3
    cnt = oh3.sum(0)
    cnt_cl = cnt.copy()
    cnt_cl[cnt_cl == 0] = 1
    ave_CxA = fbs.sum(0) / cnt_cl
    var_temp = ((fbs - ave_CxA[None] * oh3) ** 2).sum(0) / cnt_cl
    sum_w = onehot.sum(0)[:, None]
    with np.errstate(divide='ignore', invalid='ignore'):
        w = sum_w / (sum_w + amount[:, None])
    w[np.isnan(w)] = 0.0
    add_cv = w * (1 - w) * (ave - ave_CxA) ** 2
    new_cov = cov * (1 - w) + var_temp * w + add_cv
    new_ave = ave * (1 - w) + ave_CxA * w
    new_amount = amount + onehot.sum(0)
    return new_cov, new_ave, new_amount


def _ref_isda_aug(weight_m, cov, y_nchw, labels_nhw, ratio):
    N, C, H, W = y_nchw.shape
    y_flat = y_nchw.transpose(0, 2, 3, 1).reshape(-1, C)
    labels = labels_nhw.reshape(-1)
    mask = (labels == 255).astype(np.int64)
    lab = (1 - mask) * labels
    wk = weight_m[lab]                                               # (M, A)
    cvk = cov[lab]                                                   # (M, A)
    diff = weight_m[None, :, :] - wk[:, None, :]                     # (M, C, A)
    sigma2 = ratio * (diff ** 2 * cvk[:, None, :]).sum(-1)           # (M, C)
    aug = y_flat + 0.5 * sigma2 * (1 - mask)[:, None]
    return aug.reshape(N, H, W, C).transpose(0, 3, 1, 2)


if __name__ == "__main__":
    key = jax.random.PRNGKey(0)
    N, A, H, W = 2, 32, 16, 16
    class_num = 19          # estimator internally uses class_num + 1 = 20 classes
    h, w = 8, 8             # low-res target, nearest-upsampled to (H, W)
    ratio = 0.5

    k1, k2, k3, k4 = jax.random.split(key, 4)
    features = jax.random.normal(k1, (N, A, H, W), dtype=jnp.float32)
    y = jax.random.normal(k2, (N, class_num, H, W), dtype=jnp.float32)
    conv_weight = 0.1 * jax.random.normal(k3, (class_num, A, 1, 1), dtype=jnp.float32)
    target_x = jax.random.randint(k4, (N, h, w), 0, class_num, dtype=jnp.int32)
    target_x = target_x.at[0, 0, 0].set(255)      # sprinkle ignore labels
    target_x = target_x.at[1, 3, 5].set(255)

    cov0 = jnp.zeros((class_num + 1, A), jnp.float32)
    ave0 = jnp.zeros((class_num + 1, A), jnp.float32)
    amt0 = jnp.zeros((class_num + 1,), jnp.float32)

    fwd = jax.jit(isda_loss_forward)
    aug, (cov1, ave1, amt1) = fwd(features, conv_weight, y, target_x, ratio,
                                  cov0, ave0, amt0)
    jax.block_until_ready(aug)
    jax.block_until_ready(cov1)

    # --- numpy references ---
    row_idx = (np.arange(H) * h) // H
    col_idx = (np.arange(W) * w) // W
    tgt_np = np.asarray(target_x)[:, row_idx][:, :, col_idx]                 # (N, H, W)
    feats_np = np.asarray(features).transpose(0, 2, 3, 1).reshape(-1, A)
    ref_cov, ref_ave, ref_amt = _ref_update_cv(
        np.zeros((class_num + 1, A), np.float32),
        np.zeros((class_num + 1, A), np.float32),
        np.zeros((class_num + 1,), np.float32),
        feats_np, tgt_np.reshape(-1), class_num + 1)
    ref_aug = _ref_isda_aug(np.asarray(conv_weight).reshape(class_num, A),
                            ref_cov, np.asarray(y), tgt_np, ratio)

    assert aug.shape == (N, class_num, H, W)
    np.testing.assert_allclose(np.asarray(amt1), ref_amt, rtol=1e-5, atol=1e-5)
    np.testing.assert_allclose(np.asarray(ave1), ref_ave, rtol=1e-3, atol=1e-3)
    np.testing.assert_allclose(np.asarray(cov1), ref_cov, rtol=1e-3, atol=1e-3)
    np.testing.assert_allclose(np.asarray(aug), ref_aug, rtol=1e-3, atol=1e-3)
    print("KERNEL_OK")
</pallas_src>

<mosaic_0001>
module attributes {stable_mosaic.version = 11 : i64} {
  func.func @kernel(%arg0: i32, %arg1: i32, %arg2: memref<1x1x256xi32, #tpu.memory_space<vmem>>, %arg3: memref<1x32x256xf32, #tpu.memory_space<vmem>>, %arg4: memref<20x1xf32, #tpu.memory_space<vmem>>, %arg5: memref<20x32xf32, #tpu.memory_space<vmem>>, %arg6: memref<20x32xf32, #tpu.memory_space<vmem>>) attributes {dimension_semantics = [#tpu.dimension_semantics<arbitrary>, #tpu.dimension_semantics<arbitrary>], iteration_bounds = array<i64: 2, 1>, scalar_prefetch = 0 : i64, scratch_operands = 0 : i64, tpu.core_type = #tpu.core_type<tc>, window_params = [{transform_indices = @transform_0, window_bounds = array<i64: 1, 1, 256>}, {transform_indices = @transform_1, window_bounds = array<i64: 1, 32, 256>}, {pipeline_mode = #tpu.pipeline_mode<synchronous>, transform_indices = @transform_2, window_bounds = array<i64: 20, 1>}, {pipeline_mode = #tpu.pipeline_mode<synchronous>, transform_indices = @transform_3, window_bounds = array<i64: 20, 32>}, {pipeline_mode = #tpu.pipeline_mode<synchronous>, transform_indices = @transform_4, window_bounds = array<i64: 20, 32>}]} {
    %c0_i32 = arith.constant 0 : i32
    %0 = arith.cmpi eq, %arg0, %c0_i32 : i32
    %c0_i32_0 = arith.constant 0 : i32
    %1 = arith.cmpi eq, %arg1, %c0_i32_0 : i32
    %2 = arith.andi %0, %1 : i1
    %3 = arith.extui %2 : i1 to i32
    %c0_i32_1 = arith.constant 0 : i32
    %4 = arith.cmpi ne, %3, %c0_i32_1 : i32
    scf.if %4 {
      %cst_22 = arith.constant 0.000000e+00 : f32
      %40 = vector.broadcast %cst_22 : f32 to vector<20x1xf32>
      %c0_23 = arith.constant 0 : index
      %c0_24 = arith.constant 0 : index
      %41 = vector.load %arg4[%c0_23, %c0_24] : memref<20x1xf32, #tpu.memory_space<vmem>>, vector<20x1xf32>
      tpu.vector_store %arg4[%c0_23, %c0_24], %40 {strides = array<i32>} : memref<20x1xf32, #tpu.memory_space<vmem>>, vector<20x1xf32>,
      %cst_25 = arith.constant 0.000000e+00 : f32
      %42 = vector.broadcast %cst_25 : f32 to vector<20x32xf32>
      %c0_26 = arith.constant 0 : index
      %c0_27 = arith.constant 0 : index
      %43 = vector.load %arg5[%c0_26, %c0_27] : memref<20x32xf32, #tpu.memory_space<vmem>>, vector<20x32xf32>
      tpu.vector_store %arg5[%c0_26, %c0_27], %42 {strides = array<i32>} : memref<20x32xf32, #tpu.memory_space<vmem>>, vector<20x32xf32>,
      %cst_28 = arith.constant 0.000000e+00 : f32
      %44 = vector.broadcast %cst_28 : f32 to vector<20x32xf32>
      %c0_29 = arith.constant 0 : index
      %c0_30 = arith.constant 0 : index
      %45 = vector.load %arg6[%c0_29, %c0_30] : memref<20x32xf32, #tpu.memory_space<vmem>>, vector<20x32xf32>
      tpu.vector_store %arg6[%c0_29, %c0_30], %44 {strides = array<i32>} : memref<20x32xf32, #tpu.memory_space<vmem>>, vector<20x32xf32>,
    } else {
    }
    %c0 = arith.constant 0 : index
    %c0_2 = arith.constant 0 : index
    %c0_3 = arith.constant 0 : index
    %5 = vector.load %arg2[%c0, %c0_2, %c0_3] : memref<1x1x256xi32, #tpu.memory_space<vmem>>, vector<1x1x256xi32>
    %6 = vector.shape_cast %5 : vector<1x1x256xi32> to vector<1x256xi32>
    %c255_i32 = arith.constant 255 : i32
    %7 = vector.broadcast %c255_i32 : i32 to vector<1x256xi32>
    %8 = arith.cmpi eq, %6, %7 : vector<1x256xi32>
    %c19_i32 = arith.constant 19 : i32
    %9 = vector.broadcast %c19_i32 : i32 to vector<1x256xi32>
    %10 = arith.select %8, %9, %6 : vector<1x256xi1>, vector<1x256xi32>
    %c256_i32 = arith.constant 256 : i32
    %11 = arith.muli %arg1, %c256_i32 : i32
    %12 = tpu.iota {dimensions = array<i32: 1>} : vector<1x256xi32>
    %13 = vector.broadcast %11 : i32 to vector<1x256xi32>
    %14 = arith.addi %13, %12 : vector<1x256xi32>
    %c256_i32_4 = arith.constant 256 : i32
    %15 = vector.broadcast %c256_i32_4 : i32 to vector<1x256xi32>
    %16 = arith.cmpi slt, %14, %15 : vector<1x256xi32>
    %17 = tpu.iota {dimensions = array<i32: 0>} : vector<20x256xi32>
    %18 = vector.broadcast %10 : vector<1x256xi32> to vector<20x256xi32>
    %19 = arith.cmpi eq, %18, %17 : vector<20x256xi32>
    %20 = vector.broadcast %16 : vector<1x256xi1> to vector<20x256xi1>
    %21 = arith.andi %19, %20 : vector<20x256xi1>
    %22 = arith.extui %21 : vector<20x256xi1> to vector<20x256xi32>
    %23 = arith.sitofp %22 : vector<20x256xi32> to vector<20x256xf32>
    %c0_5 = arith.constant 0 : index
    %c0_6 = arith.constant 0 : index
    %c0_7 = arith.constant 0 : index
    %24 = vector.load %arg3[%c0_5, %c0_6, %c0_7] : memref<1x32x256xf32, #tpu.memory_space<vmem>>, vector<1x32x256xf32>
    %25 = vector.shape_cast %24 : vector<1x32x256xf32> to vector<32x256xf32>
    %c0_8 = arith.constant 0 : index
    %c0_9 = arith.constant 0 : index
    %26 = vector.load %arg5[%c0_8, %c0_9] : memref<20x32xf32, #tpu.memory_space<vmem>>, vector<20x32xf32>
    %cst = arith.constant dense<0.000000e+00> : vector<20x32xf32>
    %27 = tpu.matmul %23, %25, %cst {dimension_numbers = #tpu.dot_dimension_numbers<[1], [1], [0], [0], [0, 0, 1, 0], [], []>} : vector<20x256xf32>, vector<32x256xf32>, vector<20x32xf32> -> vector<20x32xf32>
    %28 = arith.addf %26, %27 : vector<20x32xf32>
    %c0_10 = arith.constant 0 : index
    %c0_11 = arith.constant 0 : index
    %29 = vector.load %arg5[%c0_10, %c0_11] : memref<20x32xf32, #tpu.memory_space<vmem>>, vector<20x32xf32>
    tpu.vector_store %arg5[%c0_10, %c0_11], %28 {strides = array<i32>} : memref<20x32xf32, #tpu.memory_space<vmem>>, vector<20x32xf32>,
    %c0_12 = arith.constant 0 : index
    %c0_13 = arith.constant 0 : index
    %30 = vector.load %arg6[%c0_12, %c0_13] : memref<20x32xf32, #tpu.memory_space<vmem>>, vector<20x32xf32>
    %31 = arith.mulf %25, %25 : vector<32x256xf32>
    %cst_14 = arith.constant dense<0.000000e+00> : vector<20x32xf32>
    %32 = tpu.matmul %23, %31, %cst_14 {dimension_numbers = #tpu.dot_dimension_numbers<[1], [1], [0], [0], [0, 0, 1, 0], [], []>} : vector<20x256xf32>, vector<32x256xf32>, vector<20x32xf32> -> vector<20x32xf32>
    %33 = arith.addf %30, %32 : vector<20x32xf32>
    %c0_15 = arith.constant 0 : index
    %c0_16 = arith.constant 0 : index
    %34 = vector.load %arg6[%c0_15, %c0_16] : memref<20x32xf32, #tpu.memory_space<vmem>>, vector<20x32xf32>
    tpu.vector_store %arg6[%c0_15, %c0_16], %33 {strides = array<i32>} : memref<20x32xf32, #tpu.memory_space<vmem>>, vector<20x32xf32>,
    %c0_17 = arith.constant 0 : index
    %c0_18 = arith.constant 0 : index
    %35 = vector.load %arg4[%c0_17, %c0_18] : memref<20x1xf32, #tpu.memory_space<vmem>>, vector<20x1xf32>
    %cst_19 = arith.constant dense<0.000000e+00> : vector<20xf32>
    %36 = vector.multi_reduction <add>, %23, %cst_19 [1] : vector<20x256xf32> to vector<20xf32>
    %37 = vector.shape_cast %36 : vector<20xf32> to vector<20x1xf32>
    %38 = arith.addf %35, %37 : vector<20x1xf32>
    %c0_20 = arith.constant 0 : index
    %c0_21 = arith.constant 0 : index
    %39 = vector.load %arg4[%c0_20, %c0_21] : memref<20x1xf32, #tpu.memory_space<vmem>>, vector<20x1xf32>
    tpu.vector_store %arg4[%c0_20, %c0_21], %38 {strides = array<i32>} : memref<20x1xf32, #tpu.memory_space<vmem>>, vector<20x1xf32>,
    return
  }
  func.func @transform_0(%arg0: i32, %arg1: i32) -> (i32, i32, i32) {
    %c0_i32 = arith.constant 0 : i32
    %c0_i32_0 = arith.constant 0 : i32
    return %arg0, %c0_i32, %arg1 : i32, i32, i32
  }
  func.func @transform_1(%arg0: i32, %arg1: i32) -> (i32, i32, i32) {
    %c0_i32 = arith.constant 0 : i32
    %c0_i32_0 = arith.constant 0 : i32
    return %arg0, %c0_i32, %arg1 : i32, i32, i32
  }
  func.func @transform_2(%arg0: i32, %arg1: i32) -> (i32, i32) {
    %c0_i32 = arith.constant 0 : i32
    %c0_i32_0 = arith.constant 0 : i32
    %c0_i32_1 = arith.constant 0 : i32
    return %c0_i32, %c0_i32_0 : i32, i32
  }
  func.func @transform_3(%arg0: i32, %arg1: i32) -> (i32, i32) {
    %c0_i32 = arith.constant 0 : i32
    %c0_i32_0 = arith.constant 0 : i32
    %c0_i32_1 = arith.constant 0 : i32
    return %c0_i32, %c0_i32_0 : i32, i32
  }
  func.func @transform_4(%arg0: i32, %arg1: i32) -> (i32, i32) {
    %c0_i32 = arith.constant 0 : i32
    %c0_i32_0 = arith.constant 0 : i32
    %c0_i32_1 = arith.constant 0 : i32
    return %c0_i32, %c0_i32_0 : i32, i32
  }
}

module attributes {stable_mosaic.version = 11 : i64} {
  func.func @_isda_aug_kernel(%arg0: i32, %arg1: i32, %arg2: memref<1x1x256xi32, #tpu.memory_space<vmem>>, %arg3: memref<1x19x256xf32, #tpu.memory_space<vmem>>, %arg4: memref<19x19xf32, #tpu.memory_space<vmem>>, %arg5: memref<1x19x256xf32, #tpu.memory_space<vmem>>) attributes {dimension_semantics = [#tpu.dimension_semantics<parallel>, #tpu.dimension_semantics<parallel>], iteration_bounds = array<i64: 2, 1>, scalar_prefetch = 0 : i64, scratch_operands = 0 : i64, tpu.core_type = #tpu.core_type<tc>, window_params = [{transform_indices = @transform_0, window_bounds = array<i64: 1, 1, 256>}, {transform_indices = @transform_1, window_bounds = array<i64: 1, 19, 256>}, {pipeline_mode = #tpu.pipeline_mode<synchronous>, transform_indices = @transform_2, window_bounds = array<i64: 19, 19>}, {transform_indices = @transform_3, window_bounds = array<i64: 1, 19, 256>}]} {
    %c0 = arith.constant 0 : index
    %c0_0 = arith.constant 0 : index
    %c0_1 = arith.constant 0 : index
    %0 = vector.load %arg2[%c0, %c0_0, %c0_1] : memref<1x1x256xi32, #tpu.memory_space<vmem>>, vector<1x1x256xi32>
    %1 = vector.shape_cast %0 : vector<1x1x256xi32> to vector<1x256xi32>
    %2 = tpu.iota {dimensions = array<i32: 0>} : vector<19x256xi32>
    %3 = vector.broadcast %1 : vector<1x256xi32> to vector<19x256xi32>
    %4 = arith.cmpi eq, %3, %2 : vector<19x256xi32>
    %5 = arith.extui %4 : vector<19x256xi1> to vector<19x256xi32>
    %6 = arith.sitofp %5 : vector<19x256xi32> to vector<19x256xf32>
    %c0_2 = arith.constant 0 : index
    %c0_3 = arith.constant 0 : index
    %7 = vector.load %arg4[%c0_2, %c0_3] : memref<19x19xf32, #tpu.memory_space<vmem>>, vector<19x19xf32>
    %cst = arith.constant dense<0.000000e+00> : vector<19x256xf32>
    %8 = tpu.matmul %7, %6, %cst {dimension_numbers = #tpu.dot_dimension_numbers<[1], [0], [0], [1], [0, 0, 1, 1], [], []>} : vector<19x19xf32>, vector<19x256xf32>, vector<19x256xf32> -> vector<19x256xf32>
    %c0_4 = arith.constant 0 : index
    %c0_5 = arith.constant 0 : index
    %c0_6 = arith.constant 0 : index
    %9 = vector.load %arg3[%c0_4, %c0_5, %c0_6] : memref<1x19x256xf32, #tpu.memory_space<vmem>>, vector<1x19x256xf32>
    %10 = vector.shape_cast %9 : vector<1x19x256xf32> to vector<19x256xf32>
    %11 = arith.addf %10, %8 : vector<19x256xf32>
    %c0_7 = arith.constant 0 : index
    %c0_8 = arith.constant 0 : index
    %c0_9 = arith.constant 0 : index
    %12 = vector.load %arg5[%c0_7, %c0_8, %c0_9] : memref<1x19x256xf32, #tpu.memory_space<vmem>>, vector<1x19x256xf32>
    %13 = vector.shape_cast %12 : vector<1x19x256xf32> to vector<19x256xf32>
    %14 = vector.shape_cast %11 : vector<19x256xf32> to vector<1x19x256xf32>
    tpu.vector_store %arg5[%c0_7, %c0_8, %c0_9], %14 {strides = array<i32>} : memref<1x19x256xf32, #tpu.memory_space<vmem>>, vector<1x19x256xf32>,
    return
  }
  func.func @transform_0(%arg0: i32, %arg1: i32) -> (i32, i32, i32) {
    %c0_i32 = arith.constant 0 : i32
    %c0_i32_0 = arith.constant 0 : i32
    return %arg0, %c0_i32, %arg1 : i32, i32, i32
  }
  func.func @transform_1(%arg0: i32, %arg1: i32) -> (i32, i32, i32) {
    %c0_i32 = arith.constant 0 : i32
    %c0_i32_0 = arith.constant 0 : i32
    return %arg0, %c0_i32, %arg1 : i32, i32, i32
  }
  func.func @transform_2(%arg0: i32, %arg1: i32) -> (i32, i32) {
    %c0_i32 = arith.constant 0 : i32
    %c0_i32_0 = arith.constant 0 : i32
    %c0_i32_1 = arith.constant 0 : i32
    return %c0_i32, %c0_i32_0 : i32, i32
  }
  func.func @transform_3(%arg0: i32, %arg1: i32) -> (i32, i32, i32) {
    %c0_i32 = arith.constant 0 : i32
    %c0_i32_0 = arith.constant 0 : i32
    return %arg0, %c0_i32, %arg1 : i32, i32, i32
  }
}

</mosaic_0001>

<bundles_post_ra>
// kernel: isda_loss_forward.3
= control target key start
LH: loop header
LB: loop body
LE: loop exit
PB: predicated region body
PF: predicated region fallthrough
CT: control target
= control target key end

     0   :  { %s601_s12 = smov 0   ;;  %s603_s13 = smov 0   ;;  %s650_s0 = inlined_call_operand.vmem [shape: s32[2,1,256], index: 0, kind: input, shape index: {}]   ;;  %s651_s1 = inlined_call_operand.vmem [shape: f32[2,19,256], index: 1, kind: input, shape index: {}, may-alias: {1,3}]   ;;  %s652_s2 = inlined_call_operand.vmem [shape: f32[19,19], index: 2, kind: input, shape index: {}]   ;;  %s653_s3 = inlined_call_operand.vmem [shape: f32[2,19,256], index: 3, kind: output, shape index: {}, may-alias: {1,3}]  }
   0x1   :  { %s605_s14 = smov 0  }
   0x2 LB: > { %s25_s15 = sadd.s32 1, %s573_s13  ;;  %p501_p0 = scmp.ge.s32.totalorder %s577_s14, 1  ;;  %s577_s14 = sphi %s605_s14, %s13_s14   ;;  %s573_s13 = sphi %s603_s13, %s655_s13   ;;  %s569_s12 = sphi %s601_s12, %s654_s12  }
   0x3   : > { %p27_p1 = scmp.ge.s32.totalorder %s25_s15, 2  ;;  %p174_p2 = scmp.lt.s32.totalorder %s577_s14, 3 }
   0x5   : > { %s657_s15 = smov (%p27_p1, %s25_s15), 0  ;;  %p175_p3 = pnand %p501_p0, %p174_p2 }
   0x6   : > { %p215_p4 = scmp.lt.s32.totalorder (!%p175_p3), %s569_s12, 1 }
   0x7   : > { %178 = sbr.rel (%p175_p3) target bundleno = 230 (0xe6), region = 32 }
   0xc   : > { %v244_v0 = vlaneseq  ;;  %v579_v1 = vmov 0.0   ;;  %s659_s12 = smov (!%p215_p4, %s569_s12), 1  ;;  %vm287_vm0 = vcmask 1042432   ;;  %v580_v12 = vmov 1.0   ;;  %v275_v13 = vld [vmem:[%s652_s2 + $0x8] sm:$0xff]  ;;  %v274_v14 = vld [vmem:[%s652_s2] sm:$0xff] }
   0xd   : > { %364 = vmatprep.mubr.f32.mxu1 %v579_v1  ;;  %358 = vmatprep.mubr.f32.mxu0 %v579_v1  ;;  %s502_s16 = sshll.u32 %s659_s12, 1  ;;  %vm277_vm7 = vcmask 154624   ;;  %v276_v15 = vld [vmem:[%s652_s2 + $0x10] sm:$0x7]  ;;  %s528_s26 = smul.u32 48, %s659_s12 }
   0xe   : > { %v245_v2 = vshrl.u32 %v244_v0, 7  ;;  %s221_s19 = scalar_lea.vmem %s650_s0, %s502_s16 }
   0xf   : > { %v243_v6 = vld [vmem:[%s221_s19] sm:$0x3]  ;;  %s231_s29 = scalar_lea.vmem %s651_s1, %s528_s26  ;;  %s241_s5 = scalar_lea.vmem %s653_s3, %s528_s26 }
  0x10   : > { %v254_v3 = vsub.s32 1, %v245_v2  ;;  %v250_v4 = vsub.s32 0, %v245_v2  ;;  %v247_v5 = vadd.s32 16, %v245_v2  ;;  %v246_v7 = vadd.s32 8, %v245_v2  ;;  %v379_v16 = vld [vmem:[%s231_s29 + $0x10] sm:$0xff]  ;;  %v377_v17 = vld [vmem:[%s231_s29] sm:$0xff] }
  0x11   : > { %v380_v18 = vld [vmem:[%s231_s29 + $0x18] sm:$0xff]  ;;  %v378_v21 = vld [vmem:[%s231_s29 + $0x8] sm:$0xff]  ;;  %v381_v22 = vld [vmem:[%s231_s29 + $0x20] sm:$0x7] }
  0x12   : > { %v255_v8 = vrot.slane %v243_v6, %v254_v3  ;;  %v251_v9 = vrot.slane %v243_v6, %v250_v4  ;;  %v382_v23 = vld [vmem:[%s231_s29 + $0x28] sm:$0x7] }
  0x14   : > { %vm261_vm1 = vcmp.eq.s32.totalorder %v255_v8, %v247_v5  ;;  %vm260_vm2 = vcmp.eq.s32.totalorder %v251_v9, %v247_v5  ;;  %vm259_vm3 = vcmp.eq.s32.totalorder %v255_v8, %v246_v7  ;;  %vm258_vm4 = vcmp.eq.s32.totalorder %v251_v9, %v246_v7 }
  0x15   : > { %v510_v10 = vsel %vm261_vm1, 1.0, %v579_v1  ;;  %v509_v11 = vsel %vm260_vm2, 1.0, %v579_v1  ;;  %vm257_vm5 = vcmp.eq.s32.totalorder %v255_v8, %v245_v2  ;;  %vm256_vm6 = vcmp.eq.s32.totalorder %v251_v9, %v245_v2 }
  0x16   : > { %522 = vmatprep.subr.msk.mxu1 %vm287_vm0, %v510_v10  ;;  %511 = vmatprep.subr.msk.mxu0 %vm287_vm0, %v510_v10 }
  0x17   : > { %525 = vmatpush1.msk.msra.mxu1 %vm287_vm0, %v509_v11  ;;  %512 = vmatpush1.msk.msra.mxu0 %vm287_vm0, %v509_v11 }
  0x18   : > { %523 = vmatprep.subr.msk.mxu1 %vm259_vm3, %v580_v12  ;;  %513 = vmatprep.subr.msk.mxu0 %vm259_vm3, %v580_v12 }
  0x19   : > { %526 = vmatpush1.msk.msra.mxu1 %vm258_vm4, %v580_v12  ;;  %514 = vmatpush1.msk.msra.mxu0 %vm258_vm4, %v580_v12 }
  0x1a   : > { %524 = vmatprep.subr.msk.mxu1 %vm257_vm5, %v580_v12  ;;  %515 = vmatprep.subr.msk.mxu0 %vm257_vm5, %v580_v12 }
  0x1b   : > { %527 = vmatpush1.msk.msra.mxu1 %vm256_vm6, %v580_v12  ;;  %516 = vmatpush1.msk.msra.mxu0 %vm256_vm6, %v580_v12 }
  0x1c   : > { %518 = vmatmul.mubr.msk.f32.vlgmr.msra.gmra.mxu1 %vm277_vm7, %v275_v13  ;;  %517 = vmatmul.mubr.msk.f32.vlgmr.msra.gmra.mxu0 %vm277_vm7, %v274_v14 }
  0x1d   : > { %370 = vmatprep.mubr.f32.mxu1 %v579_v1 }
  0x20   : > { %519 = vmatmul.mubr.msk.f32.gmra.mxu1 %vm277_vm7, %v276_v15 }
  0xdc   : > { %v366_v19 = vpop.f32.mrf.mxu1  ;;  %v360_v20 = vpop.f32.mrf.mxu0 }
  0xdd   : > { %v385_v24 = vadd.f32 %v379_v16, %v366_v19  ;;  %v383_v25 = vadd.f32 %v377_v17, %v360_v20 }
  0xde   : > { %v368_v26 = vpop.f32.mrf.mxu1  ;;  %v362_v27 = vpop.f32.mrf.mxu0 }
  0xdf   : > { %v386_v28 = vadd.f32 %v380_v18, %v368_v26  ;;  %v384_v29 = vadd.f32 %v378_v21, %v362_v27  ;;  %389 = vst [vmem:[%s241_s5] sm:$0xff] %v383_v25  ;;  %391 = vst [vmem:[%s241_s5 + $0x10] sm:$0xff] %v385_v24 }
  0xe0   : > { %v372_v30 = vpop.f32.mrf.mxu1 }
  0xe1   : > { %v387_v31 = vadd.f32 %v381_v22, %v372_v30  ;;  %390 = vst [vmem:[%s241_s5 + $0x8] sm:$0xff] %v384_v29  ;;  %392 = vst [vmem:[%s241_s5 + $0x18] sm:$0xff] %v386_v28 }
  0xe2   : > { %v374_v32 = vpop.f32.mrf.mxu1 }
  0xe3   : > { %v388_v33 = vadd.f32 %v382_v23, %v374_v32  ;;  %393 = vst [vmem:[%s241_s5 + $0x20] sm:$0x7] %v387_v31 }
  0xe5   : > { %394 = vst [vmem:[%s241_s5 + $0x28] sm:$0x7] %v388_v33 }
  0xe6 PF: > { %s13_s14 = sadd.s32 1, %s577_s14   ;;  %s654_s12 = smov %s573_s13 }
  0xe7   : > { %p10_p5 = scmp.ge.s32.totalorder %s13_s14, 4   ;;  %s655_s13 = smov %s657_s15 }
  0xe9   :  { %12 = sbr.rel (!%p10_p5) target bundleno = 2 (0x2), region = 65 }

// kernel: isda_loss_forward.2
= control target key start
LH: loop header
LB: loop body
LE: loop exit
PB: predicated region body
PF: predicated region fallthrough
CT: control target
= control target key end

     0   :  { %s707_s15 = smov 0   ;;  %s709_s16 = smov 0   ;;  %s852_s0 = inlined_call_operand.vmem [shape: s32[2,1,256], index: 0, kind: input, shape index: {}]   ;;  %s853_s1 = inlined_call_operand.vmem [shape: f32[2,32,256], index: 1, kind: input, shape index: {}]   ;;  %s854_s2 = inlined_call_operand.vmem [shape: f32[20,1], index: 2, kind: output, shape index: {0}]   ;;  %s855_s3 = inlined_call_operand.vmem [shape: f32[20,32], index: 3, kind: output, shape index: {1}]   ;;  %s856_s4 = inlined_call_operand.vmem [shape: f32[20,32], index: 4, kind: output, shape index: {2}]  }
   0x1   :  { %s711_s17 = smov 0  }
   0x2 LB: > { %s27_s18 = sadd.s32 1, %s673_s16  ;;  %p601_p0 = scmp.ge.s32.totalorder %s677_s17, 1  ;;  %s677_s17 = sphi %s711_s17, %s15_s17   ;;  %s673_s16 = sphi %s709_s16, %s858_s16   ;;  %s669_s15 = sphi %s707_s15, %s857_s15  }
   0x3   : > { %p29_p1 = scmp.ge.s32.totalorder %s27_s18, 2  ;;  %p187_p2 = scmp.lt.s32.totalorder %s677_s17, 3 }
   0x5   : > { %s860_s18 = smov (%p29_p1, %s27_s18), 0  ;;  %p188_p3 = pnand %p601_p0, %p187_p2 }
   0x6   : > { %p221_p4 = scmp.lt.s32.totalorder (!%p188_p3), %s669_s15, 1  ;;  %p239_p5 = scmp.eq.s32.totalorder (!%p188_p3), %s669_s15, 0 }
   0x7   : > { %191 = sbr.rel (%p188_p3) target bundleno = 241 (0xf1), region = 28 }
   0xc   : > { %s862_s15 = smov (!%p221_p4, %s669_s15), 1  ;;  %244 = sbr.rel (!%p239_p5) target bundleno = 18 (0x12), region = 32  ;;  %vm245_vm0 = vcmask (%p239_p5), 7168   ;;  %vm248_vm1 = vcmask (%p239_p5), 3072   ;;  %vm250_vm2 = vcmask (%p239_p5), 261120   ;;  %v679_v0 = vmov (%p239_p5), 0.0  }
   0xd   : > { %s602_s19 = sshll.u32 %s862_s15, 1  ;;  %s626_s20 = sshll.u32 %s862_s15, 6  ;;  %246 = vst.msk [vmem:[%s854_s2] sm:$0xff] (%p239_p5), %vm245_vm0, %v679_v0  ;;  %247 = vst.msk [vmem:[%s854_s2 + $0x8] sm:$0xff] (%p239_p5), %vm245_vm0, %v679_v0  ;;  %vm253_vm3 = vcmask (%p239_p5), 257024  }
   0xe   : > { %s227_s23 = scalar_lea.vmem %s852_s0, %s602_s19  ;;  %s731_s26 = scalar_lea.vmem %s853_s1, %s626_s20  ;;  %249 = vst.msk [vmem:[%s854_s2 + $0x10] sm:$0xf] (%p239_p5), %vm248_vm1, %v679_v0 }
   0xf   : > { %251 = vst.msk [vmem:[%s855_s3] sm:$0xff] (%p239_p5), %vm250_vm2, %v679_v0  ;;  %252 = vst.msk [vmem:[%s855_s3 + $0x8] sm:$0xff] (%p239_p5), %vm250_vm2, %v679_v0 }
  0x10   : > { %255 = vst.msk [vmem:[%s856_s4] sm:$0xff] (%p239_p5), %vm250_vm2, %v679_v0  ;;  %256 = vst.msk [vmem:[%s856_s4 + $0x8] sm:$0xff] (%p239_p5), %vm250_vm2, %v679_v0 }
  0x11   : > { %254 = vst.msk [vmem:[%s855_s3 + $0x10] sm:$0xf] %vm253_vm3, %v679_v0  ;;  %257 = vst.msk [vmem:[%s856_s4 + $0x10] sm:$0xf] %vm253_vm3, %v679_v0 }
  0x12 PF: > { %v317_v1 = vld [vmem:[%s731_s26 + $0x38] sm:$0xff]  ;;  %v316_v2 = vld [vmem:[%s731_s26 + $0x30] sm:$0xff]  ;;  %v315_v3 = vld [vmem:[%s731_s26 + $0x28] sm:$0xff]  ;;  %v270_v4 = vlaneseq  ;;  %vm515_vm5 = vcmask 1043456   ;;  %v680_v26 = vmov 1.0   ;;  %v681_v27 = vmov 0.0  }
  0x13   : > { %345 = vmatprep.subr.mxu0 %v317_v1  ;;  %v419_v5 = vmul.f32 %v317_v1, %v317_v1  ;;  %v418_v6 = vmul.f32 %v316_v2, %v316_v2  ;;  %v417_v7 = vmul.f32 %v315_v3, %v315_v3  ;;  %v314_v8 = vld [vmem:[%s731_s26 + $0x20] sm:$0xff]  ;;  %v313_v9 = vld [vmem:[%s731_s26 + $0x18] sm:$0xff]  ;;  %v312_v13 = vld [vmem:[%s731_s26 + $0x10] sm:$0xff]  ;;  %vm524_vm12 = vcmask 7168  }
  0x14   : > { %346 = vmatpush1.xpose.msra.mxu0 %v316_v2  ;;  %v258_v10 = vld [vmem:[%s227_s23] sm:$0x3]  ;;  %v271_v11 = vshrl.u32 %v270_v4, 7  ;;  %v416_v12 = vmul.f32 %v314_v8, %v314_v8  ;;  %v311_v14 = vld [vmem:[%s731_s26 + $0x8] sm:$0xff]  ;;  %v415_v19 = vmul.f32 %v313_v9, %v313_v9  ;;  %v414_v23 = vmul.f32 %v312_v13, %v312_v13 }
  0x15   : > { %444 = vmatprep.subr.mxu1 %v419_v5  ;;  %347 = vmatprep.subr.mxu0 %v315_v3  ;;  %vm259_vm4 = vcmp.eq.s32.totalorder %v258_v10, 255  ;;  %v413_v24 = vmul.f32 %v311_v14, %v311_v14  ;;  %v310_v25 = vld [vmem:[%s731_s26] sm:$0xff]  ;;  %vm527_vm13 = vcmask 3072   ;;  %v507_v45 = vld [vmem:[%s854_s2 + $0x8] sm:$0xff]  ;;  %vm404_vm14 = vcmask 261120  }
  0x16   : > { %445 = vmatpush1.xpose.msra.mxu1 %v418_v6  ;;  %v260_v15 = vsel %vm259_vm4, 19, %v258_v10  ;;  %v280_v16 = vsub.s32 1, %v271_v11  ;;  %v276_v17 = vsub.s32 0, %v271_v11  ;;  %v272_v18 = vadd.s32 8, %v271_v11  ;;  %v506_v40 = vld [vmem:[%s854_s2] sm:$0xff] }
  0x17   : > { %446 = vmatprep.subr.mxu1 %v417_v7  ;;  %v273_v20 = vadd.s32 16, %v271_v11  ;;  %v412_v37 = vmul.f32 %v310_v25, %v310_v25  ;;  %v508_v42 = vld [vmem:[%s854_s2 + $0x10] sm:$0xf]  ;;  %v318_v49 = vld [vmem:[%s855_s3] sm:$0xff]  ;;  %v319_v55 = vld [vmem:[%s855_s3 + $0x8] sm:$0xff]  ;;  %vm407_vm15 = vcmask 257024  }
  0x18   : > { %348 = vmatpush1.xpose.msra.mxu0 %v314_v8  ;;  %v281_v21 = vrot.slane %v260_v15, %v280_v16  ;;  %v277_v22 = vrot.slane %v260_v15, %v276_v17  ;;  %v409_v51 = vld [vmem:[%s856_s4] sm:$0xff]  ;;  %v410_v59 = vld [vmem:[%s856_s4 + $0x8] sm:$0xff]  ;;  %v320_v63 = vld [vmem:[%s855_s3 + $0x10] sm:$0xf] }
  0x19   : > { %349 = vmatprep.subr.mxu0 %v313_v9  ;;  %v411_v3 = vld [vmem:[%s856_s4 + $0x10] sm:$0xf] }
  0x1a   : > { %447 = vmatpush1.xpose.msra.mxu1 %v416_v12  ;;  %vm283_vm6 = vcmp.eq.s32.totalorder %v281_v21, %v271_v11  ;;  %vm282_vm7 = vcmp.eq.s32.totalorder %v277_v22, %v271_v11  ;;  %vm285_vm8 = vcmp.eq.s32.totalorder %v281_v21, %v272_v18  ;;  %vm284_vm9 = vcmp.eq.s32.totalorder %v277_v22, %v272_v18 }
  0x1b   : > { %448 = vmatprep.subr.mxu1 %v415_v19  ;;  %612 = vmatprep.mubr.msk.f32.mxu0 %vm283_vm6, %v680_v26  ;;  %vm287_vm10 = vcmp.eq.s32.totalorder %v281_v21, %v273_v20  ;;  %vm286_vm11 = vcmp.eq.s32.totalorder %v277_v22, %v273_v20  ;;  %v606_v28 = vsel %vm282_vm7, 1.0, %v681_v27  ;;  %v607_v29 = vsel %vm283_vm6, 1.0, %v681_v27 }
  0x1c   : > { %350 = vmatpush1.xpose.msra.mxu0 %v312_v13  ;;  %618 = vmatprep.mubr.msk.f32.mxu1 %vm283_vm6, %v680_v26  ;;  %v509_v30 = vadd.f32 %v607_v29, %v606_v28  ;;  %v610_v31 = vsel %vm286_vm11, 1.0, %v681_v27  ;;  %v611_v32 = vsel %vm287_vm10, 1.0, %v681_v27  ;;  %v608_v33 = vsel %vm284_vm9, 1.0, %v681_v27 }
  0x1d   : > { %351 = vmatprep.subr.mxu0 %v311_v14  ;;  %v516_v34 = vsel %vm515_vm5, %v610_v31, 0.0  ;;  %v517_v35 = vsel %vm515_vm5, %v611_v32, 0.0  ;;  %v609_v36 = vsel %vm285_vm8, 1.0, %v681_v27 }
  0x1e   : > { %449 = vmatpush1.xpose.msra.mxu1 %v414_v23  ;;  %510 = vadd.xlane.f32.xlu0 %v509_v30  ;;  %v518_v38 = vadd.f32 %v517_v35, %v516_v34  ;;  %v512_v39 = vadd.f32 %v609_v36, %v608_v33 }
  0x1f   : > { %450 = vmatprep.subr.mxu1 %v413_v24 }
  0x20   : > { %352 = vmatpush1.xpose.msra.mxu0 %v310_v25  ;;  %519 = vadd.xlane.f32.xlu1 %v518_v38 }
  0x22   : > { %451 = vmatpush1.xpose.msra.mxu1 %v412_v37  ;;  %513 = vadd.xlane.f32.xlu0 %v512_v39 }
  0x23   : > { %613 = vmatmul.mubr.msk.f32.vlgmr.msra.gmra.mxu0 %vm282_vm7, %v680_v26 }
  0x24   : > { %614 = vmatprep.mubr.msk.f32.mxu0 %vm285_vm8, %v680_v26 }
  0x25   : > { %619 = vmatmul.mubr.msk.f32.vlgmr.msra.gmra.mxu1 %vm282_vm7, %v680_v26 }
  0x26   : > { %620 = vmatprep.mubr.msk.f32.mxu1 %vm285_vm8, %v680_v26 }
  0x27   : > { %615 = vmatmul.mubr.msk.f32.gmra.mxu0 %vm284_vm9, %v680_v26 }
  0x28   : > { %616 = vmatprep.mubr.msk.f32.mxu0 %vm287_vm10, %v680_v26 }
  0x29   : > { %621 = vmatmul.mubr.msk.f32.gmra.mxu1 %vm284_vm9, %v680_v26 }
  0x2a   : > { %622 = vmatprep.mubr.msk.f32.mxu1 %vm287_vm10, %v680_v26 }
  0x2b   : > { %617 = vmatmul.mubr.msk.f32.gmra.mxu0 %vm286_vm11, %v680_v26 }
  0x2d   : > { %623 = vmatmul.mubr.msk.f32.gmra.mxu1 %vm286_vm11, %v680_v26 }
  0xa7   : > { %v511_v41 = vpop.xlane.xlu0 %510 }
  0xa8   : > { %v521_v43 = vadd.f32 %v511_v41, %v506_v40 }
  0xa9   : > { %v520_v44 = vpop.xlane.xlu1 %519 }
  0xaa   : > { %525 = vst.msk [vmem:[%s854_s2] sm:$0xff] %vm524_vm12, %v521_v43  ;;  %v523_v46 = vadd.f32 %v520_v44, %v508_v42 }
  0xab   : > { %v514_v47 = vpop.xlane.xlu0 %513 }
  0xac   : > { %528 = vst.msk [vmem:[%s854_s2 + $0x10] sm:$0xf] %vm527_vm13, %v523_v46  ;;  %v522_v48 = vadd.f32 %v514_v47, %v507_v45 }
  0xae   : > { %526 = vst.msk [vmem:[%s854_s2 + $0x8] sm:$0xff] %vm524_vm12, %v522_v48 }
  0xe3   : > { %v387_v50 = vpop.f32.mrf.mxu0 }
  0xe4   : > { %v401_v52 = vadd.f32 %v387_v50, %v318_v49 }
  0xe5   : > { %v389_v53 = vpop.f32.mrf.mxu0  ;;  %v486_v54 = vpop.f32.mrf.mxu1 }
  0xe6   : > { %405 = vst.msk [vmem:[%s855_s3] sm:$0xff] %vm404_vm14, %v401_v52  ;;  %v500_v56 = vadd.f32 %v486_v54, %v409_v51 }
  0xe7   : > { %v392_v57 = vpop.f32.mrf.mxu0  ;;  %v488_v58 = vpop.f32.mrf.mxu1 }
  0xe8   : > { %503 = vst.msk [vmem:[%s856_s4] sm:$0xff] %vm404_vm14, %v500_v56  ;;  %v402_v60 = vadd.f32 %v392_v57, %v319_v55 }
  0xe9   : > { %v394_v61 = vpop.f32.mrf.mxu0  ;;  %v491_v62 = vpop.f32.mrf.mxu1 }
  0xea   : > { %406 = vst.msk [vmem:[%s855_s3 + $0x8] sm:$0xff] %vm404_vm14, %v402_v60  ;;  %v501_v0 = vadd.f32 %v491_v62, %v410_v59 }
  0xeb   : > { %v397_v1 = vpop.f32.mrf.mxu0  ;;  %v493_v2 = vpop.f32.mrf.mxu1 }
  0xec   : > { %504 = vst.msk [vmem:[%s856_s4 + $0x8] sm:$0xff] %vm404_vm14, %v501_v0  ;;  %v403_v4 = vadd.f32 %v397_v1, %v320_v63 }
  0xed   : > { %v399_v5 = vpop.f32.mrf.mxu0  ;;  %v496_v6 = vpop.f32.mrf.mxu1 }
  0xee   : > { %408 = vst.msk [vmem:[%s855_s3 + $0x10] sm:$0xf] %vm407_vm15, %v403_v4  ;;  %v502_v7 = vadd.f32 %v496_v6, %v411_v3 }
  0xef   : > { %v498_v8 = vpop.f32.mrf.mxu1 }
  0xf0   : > { %505 = vst.msk [vmem:[%s856_s4 + $0x10] sm:$0xf] %vm407_vm15, %v502_v7 }
  0xf1 PF: > { %s15_s17 = sadd.s32 1, %s677_s17   ;;  %s857_s15 = smov %s673_s16 }
  0xf2   : > { %p12_p6 = scmp.ge.s32.totalorder %s15_s17, 4   ;;  %s858_s16 = smov %s860_s18 }
  0xf4   :  { %14 = sbr.rel (!%p12_p6) target bundleno = 2 (0x2), region = 77 }

</bundles_post_ra>
